<compile_context>
chip_gen: v7x
topology: tpu7x:2x2x1
jax: 0.10.0
libtpu: 0.0.40
codegen_flags: <defaults>
</compile_context>

<pallas_src>
import jax
import jax.numpy as jnp
from jax.experimental import pallas as pl
from jax.experimental.pallas import tpu as pltpu


# ----------------------------------------------------------------------------
# Model hyper-parameters (scaled-down but structurally identical to the module)
# ----------------------------------------------------------------------------
NUM_NODES = 16        # original default: 737
INPUT_DIM = 4         # original: 6
INPUT_LEN = 8         # original: 168
NODE_DIM = 32
EMBED_DIM = 32
TEMP_DIM_TID = 32
TEMP_DIM_DIW = 32
OUTPUT_LEN = 1
NUM_LAYER = 3
HIDDEN_DIM = EMBED_DIM + NODE_DIM + TEMP_DIM_TID + TEMP_DIM_DIW   # 128
ALIGN_DIM = 64        # hidden_align_layer out_channels (hard-coded 64)
TID_TABLE = 288
DIW_TABLE = 7

BATCH = 2
F_IN = INPUT_LEN * INPUT_DIM                      # flattened window per row
EMB_W = NODE_DIM + TEMP_DIM_TID + TEMP_DIM_DIW    # 96 pass-through channels
F_BIG = F_IN + EMB_W                              # stacked kernel input width
OUT_W = 128                                       # lane-dense packed output


def _round_up(x, m):
    return (x + m - 1) // m * m


# ----------------------------------------------------------------------------
# Pallas kernel: fused STID forward for a tile of TM (batch, node) rows.
# ----------------------------------------------------------------------------
def stid_kernel(xcat_ref, w_in_ref, b_in_ref,
                w_e0_ref, b_e0_ref,
                w_e1_ref, b_e1_ref,
                w_e2_ref, b_e2_ref,
                w_al_ref, b_al_ref,
                w_rg_ref, b_rg_ref,
                out_ref):
    # Stacked matmul builds hidden = [ts_emb | node | tid | diw] in one MXU
    # pass: W_in = [[W_ts, 0], [0, I_96]] so the channel concat is free.
    hidden = jnp.dot(xcat_ref[...], w_in_ref[...],
                     preferred_element_type=jnp.float32) + b_in_ref[...]

    # encoder: 3 x residual one-fc MLP blocks (dropout == identity in eval).
    # TODO(synk): MultiLayerPerceptron_One_Fc source not provided; implemented
    # as the standard STID one-fc residual block: h = h + relu(fc(h)).
    for w_ref, b_ref in ((w_e0_ref, b_e0_ref),
                         (w_e1_ref, b_e1_ref),
                         (w_e2_ref, b_e2_ref)):
        fc = jnp.dot(hidden.astype(jnp.bfloat16), w_ref[...],
                     preferred_element_type=jnp.float32) + b_ref[...]
        hidden = hidden + jnp.maximum(fc, 0.0)

    # hidden_align_layer (1x1 conv padded to 128 output lanes) + relu.
    # Lanes >= ALIGN_DIM see zero weights / zero bias -> stay exactly 0.
    align = jnp.dot(hidden.astype(jnp.bfloat16), w_al_ref[...],
                    preferred_element_type=jnp.float32) + b_al_ref[...]
    align = jnp.maximum(align, 0.0)

    # regression_layer: output width 1 -> VPU multiply + lane reduction
    # instead of a 1-column MXU pass / masked (TM, 1) store.
    # TODO(synk): __init__ declares regression_layer with in_channels=hidden_dim
    # but forward() feeds the 64-channel hidden_align; forward semantics kept.
    pred = jnp.sum(align * w_rg_ref[...], axis=-1, keepdims=True) + b_rg_ref[...]

    # Lane-dense 128-wide output slab: lanes [0, 64) = align,
    # lanes [64, 128) = pred (broadcast).  Single unmasked 128-lane store.
    lane = jax.lax.broadcasted_iota(jnp.int32, (1, OUT_W), 1)
    pred_mask = (lane >= ALIGN_DIM).astype(jnp.float32)
    out_ref[...] = align + pred * pred_mask


# ----------------------------------------------------------------------------
# Wrapper: glue (flatten / gathers / weight packing) + fused Pallas call
# ----------------------------------------------------------------------------
@jax.jit
def stid_forward(history_data, params):
    """history_data: [B, L, N, C] with C = INPUT_DIM + 2 (last two = tid, diw)."""
    B, L, N, _ = history_data.shape
    M = B * N
    bf = jnp.bfloat16

    # ---- glue (plain JAX): flatten window, gather embedding tables ----------
    input_data = history_data[..., :INPUT_DIM]                    # [B, L, N, Cin]
    # transpose(1,2) -> [B, N, L, Cin]; view(B, N, L*Cin)
    x_flat = jnp.transpose(input_data, (0, 2, 1, 3)).reshape(M, F_IN)

    tid_idx = jnp.clip(
        (history_data[:, -1, :, -2] * TID_TABLE).astype(jnp.int32),
        0, TID_TABLE - 1)
    diw_idx = jnp.clip(
        history_data[:, -1, :, -1].astype(jnp.int32), 0, DIW_TABLE - 1)
    tid_emb = params["time_in_day_emb"][tid_idx].reshape(M, TEMP_DIM_TID)
    diw_emb = params["day_in_week_emb"][diw_idx].reshape(M, TEMP_DIM_DIW)
    node_emb = jnp.broadcast_to(params["node_emb"][None],
                                (B, N, NODE_DIM)).reshape(M, NODE_DIM)

    # One lane-dense input slab: [x_flat | node | tid | diw]  (bf16 operands).
    xcat = jnp.concatenate([x_flat, node_emb, tid_emb, diw_emb],
                           axis=-1).astype(bf)                    # [M, F_BIG]

    # Row tile: 256 rows (matches v6e/v7x 256-tall MXU, 2x128 on v5e) when M is
    # large; at toy sizes a single grid step holds all (8-padded) rows in VMEM.
    TM = 256 if M >= 256 else _round_up(M, 8)
    M_pad = _round_up(M, TM)
    xcat = jnp.pad(xcat, ((0, M_pad - M), (0, 0)))

    # ---- pack weights: stacked input matmul + lane-padded heads -------------
    w_in = jnp.zeros((F_BIG, HIDDEN_DIM), bf)
    w_in = w_in.at[:F_IN, :EMBED_DIM].set(params["w_ts"].astype(bf))
    w_in = w_in.at[F_IN:, EMBED_DIM:].set(jnp.eye(EMB_W, dtype=bf))
    b_in = jnp.zeros((1, HIDDEN_DIM), jnp.float32)
    b_in = b_in.at[:, :EMBED_DIM].set(params["b_ts"])

    w_al = jnp.zeros((HIDDEN_DIM, OUT_W), bf)
    w_al = w_al.at[:, :ALIGN_DIM].set(params["w_al"].astype(bf))
    b_al = jnp.zeros((1, OUT_W), jnp.float32)
    b_al = b_al.at[:, :ALIGN_DIM].set(params["b_al"])

    w_rg = jnp.zeros((1, OUT_W), jnp.float32)
    w_rg = w_rg.at[:, :ALIGN_DIM].set(params["w_rg"][:, 0][None])
    b_rg = params["b_rg"].reshape(1, 1)

    # ---- fused Pallas kernel over row tiles ---------------------------------
    grid = (M_pad // TM,)
    row_spec = pl.BlockSpec((TM, F_BIG), lambda i: (i, 0))
    out_spec = pl.BlockSpec((TM, OUT_W), lambda i: (i, 0))

    def full(shape):
        return pl.BlockSpec(shape, lambda i, _s=shape: (0,) * len(_s))

    out_packed = pl.pallas_call(
        stid_kernel,
        out_shape=jax.ShapeDtypeStruct((M_pad, OUT_W), jnp.float32),
        grid_spec=pltpu.PrefetchScalarGridSpec(
            num_scalar_prefetch=0,
            grid=grid,
            in_specs=[
                row_spec,                                          # xcat
                full((F_BIG, HIDDEN_DIM)), full((1, HIDDEN_DIM)),  # stacked in
                full((HIDDEN_DIM, HIDDEN_DIM)), full((1, HIDDEN_DIM)),
                full((HIDDEN_DIM, HIDDEN_DIM)), full((1, HIDDEN_DIM)),
                full((HIDDEN_DIM, HIDDEN_DIM)), full((1, HIDDEN_DIM)),
                full((HIDDEN_DIM, OUT_W)), full((1, OUT_W)),       # align head
                full((1, OUT_W)), full((1, 1)),                    # regression
            ],
            out_specs=out_spec,
        ),
        compiler_params=pltpu.CompilerParams(
            dimension_semantics=("parallel",),      # row axis shards across TCs
            vmem_limit_bytes=32 * 1024 * 1024),
    )(xcat, w_in, b_in,
      params["w_e0"].astype(bf), params["b_e0"],
      params["w_e1"].astype(bf), params["b_e1"],
      params["w_e2"].astype(bf), params["b_e2"],
      w_al, b_al, w_rg, b_rg)

    # Unpack the lane-dense slab, drop padded rows, back to PyTorch NCHW.
    out_packed = out_packed[:M]
    align_flat = out_packed[:, :ALIGN_DIM]
    pred_flat = out_packed[:, ALIGN_DIM:ALIGN_DIM + OUTPUT_LEN]

    prediction = pred_flat.reshape(B, N, OUTPUT_LEN).transpose(0, 2, 1)[..., None]
    hidden_align = align_flat.reshape(B, N, ALIGN_DIM).transpose(0, 2, 1)[..., None]
    return prediction, hidden_align


# ----------------------------------------------------------------------------
# Deterministic parameter init (xavier-uniform-like), logical (unpacked) layout
# ----------------------------------------------------------------------------
def init_params(key):
    def xavier(key, shape):
        fan_in, fan_out = shape[0], shape[1]
        limit = (6.0 / (fan_in + fan_out)) ** 0.5
        return jax.random.uniform(key, shape, jnp.float32, -limit, limit)

    keys = jax.random.split(key, 16)
    return {
        "node_emb": xavier(keys[0], (NUM_NODES, NODE_DIM)),
        "time_in_day_emb": xavier(keys[1], (TID_TABLE, TEMP_DIM_TID)),
        "day_in_week_emb": xavier(keys[2], (DIW_TABLE, TEMP_DIM_DIW)),
        # 1x1 conv weights stored as [in, out] so kernel does x @ W + b
        "w_ts": xavier(keys[3], (F_IN, EMBED_DIM)),
        "b_ts": jnp.zeros((1, EMBED_DIM), jnp.float32),
        "w_e0": xavier(keys[4], (HIDDEN_DIM, HIDDEN_DIM)),
        "b_e0": jnp.full((1, HIDDEN_DIM), 0.01, jnp.float32),
        "w_e1": xavier(keys[5], (HIDDEN_DIM, HIDDEN_DIM)),
        "b_e1": jnp.full((1, HIDDEN_DIM), 0.01, jnp.float32),
        "w_e2": xavier(keys[6], (HIDDEN_DIM, HIDDEN_DIM)),
        "b_e2": jnp.full((1, HIDDEN_DIM), 0.01, jnp.float32),
        "w_al": xavier(keys[7], (HIDDEN_DIM, ALIGN_DIM)),
        "b_al": jnp.full((1, ALIGN_DIM), 0.02, jnp.float32),
        "w_rg": xavier(keys[8], (ALIGN_DIM, OUTPUT_LEN)),
        "b_rg": jnp.full((1, OUTPUT_LEN), 0.03, jnp.float32),
    }


# ----------------------------------------------------------------------------
# Pure-JAX reference with the same bf16-operand / f32-accumulation discipline
# ----------------------------------------------------------------------------
def stid_reference(history_data, params):
    B, L, N, _ = history_data.shape
    M = B * N
    bf = jnp.bfloat16
    x = jnp.transpose(history_data[..., :INPUT_DIM], (0, 2, 1, 3)).reshape(M, F_IN)
    tid_idx = jnp.clip((history_data[:, -1, :, -2] * TID_TABLE).astype(jnp.int32),
                       0, TID_TABLE - 1)
    diw_idx = jnp.clip(history_data[:, -1, :, -1].astype(jnp.int32),
                       0, DIW_TABLE - 1)
    tid = params["time_in_day_emb"][tid_idx].reshape(M, -1)
    diw = params["day_in_week_emb"][diw_idx].reshape(M, -1)
    node = jnp.broadcast_to(params["node_emb"][None], (B, N, NODE_DIM)).reshape(M, -1)

    ts = jnp.dot(x.astype(bf), params["w_ts"].astype(bf),
                 preferred_element_type=jnp.float32) + params["b_ts"]
    h = jnp.concatenate([ts,
                         node.astype(bf).astype(jnp.float32),
                         tid.astype(bf).astype(jnp.float32),
                         diw.astype(bf).astype(jnp.float32)], axis=-1)
    for i in range(NUM_LAYER):
        fc = jnp.dot(h.astype(bf), params[f"w_e{i}"].astype(bf),
                     preferred_element_type=jnp.float32) + params[f"b_e{i}"]
        h = h + jnp.maximum(fc, 0.0)
    align = jnp.maximum(
        jnp.dot(h.astype(bf), params["w_al"].astype(bf),
                preferred_element_type=jnp.float32) + params["b_al"], 0.0)
    pred = align @ params["w_rg"] + params["b_rg"]
    prediction = pred.reshape(B, N, OUTPUT_LEN).transpose(0, 2, 1)[..., None]
    hidden_align = align.reshape(B, N, ALIGN_DIM).transpose(0, 2, 1)[..., None]
    return prediction, hidden_align


if __name__ == "__main__":
    key = jax.random.PRNGKey(0)
    k_param, k_data, k_tid, k_diw = jax.random.split(key, 4)

    params = init_params(k_param)

    # history_data: [B, L, N, C] with C = INPUT_DIM + 2 (last two: tid frac, diw)
    data = jax.random.normal(k_data, (BATCH, INPUT_LEN, NUM_NODES, INPUT_DIM),
                             jnp.float32)
    tid_frac = jax.random.uniform(k_tid, (BATCH, INPUT_LEN, NUM_NODES, 1),
                                  jnp.float32, 0.0, 0.999)
    diw_val = jax.random.randint(k_diw, (BATCH, INPUT_LEN, NUM_NODES, 1),
                                 0, DIW_TABLE).astype(jnp.float32)
    history_data = jnp.concatenate([data, tid_frac, diw_val], axis=-1)

    pred, hidden_align = stid_forward(history_data, params)
    pred = jax.block_until_ready(pred)
    hidden_align = jax.block_until_ready(hidden_align)

    ref_pred, ref_align = stid_reference(history_data, params)
    assert pred.shape == (BATCH, OUTPUT_LEN, NUM_NODES, 1)
    assert hidden_align.shape == (BATCH, ALIGN_DIM, NUM_NODES, 1)
    assert jnp.allclose(pred, ref_pred, atol=2e-2, rtol=2e-2)
    assert jnp.allclose(hidden_align, ref_align, atol=2e-2, rtol=2e-2)

    print("KERNEL_OK")
</pallas_src>

<mosaic_0001>
module attributes {stable_mosaic.version = 11 : i64} {
  func.func @stid_kernel(%arg0: i32, %arg1: memref<32x128xbf16, #tpu.memory_space<vmem>>, %arg2: memref<128x128xbf16, #tpu.memory_space<vmem>>, %arg3: memref<1x128xf32, #tpu.memory_space<vmem>>, %arg4: memref<128x128xbf16, #tpu.memory_space<vmem>>, %arg5: memref<1x128xf32, #tpu.memory_space<vmem>>, %arg6: memref<128x128xbf16, #tpu.memory_space<vmem>>, %arg7: memref<1x128xf32, #tpu.memory_space<vmem>>, %arg8: memref<128x128xbf16, #tpu.memory_space<vmem>>, %arg9: memref<1x128xf32, #tpu.memory_space<vmem>>, %arg10: memref<128x128xbf16, #tpu.memory_space<vmem>>, %arg11: memref<1x128xf32, #tpu.memory_space<vmem>>, %arg12: memref<1x128xf32, #tpu.memory_space<vmem>>, %arg13: memref<1x1xf32, #tpu.memory_space<vmem>>, %arg14: memref<32x128xf32, #tpu.memory_space<vmem>>) attributes {dimension_semantics = [#tpu.dimension_semantics<parallel>], iteration_bounds = array<i64: 1>, scalar_prefetch = 0 : i64, scratch_operands = 0 : i64, tpu.core_type = #tpu.core_type<tc>, window_params = [{transform_indices = @transform_0, window_bounds = array<i64: 32, 128>}, {pipeline_mode = #tpu.pipeline_mode<synchronous>, transform_indices = @transform_1, window_bounds = array<i64: 128, 128>}, {pipeline_mode = #tpu.pipeline_mode<synchronous>, transform_indices = @transform_2, window_bounds = array<i64: 1, 128>}, {pipeline_mode = #tpu.pipeline_mode<synchronous>, transform_indices = @transform_3, window_bounds = array<i64: 128, 128>}, {pipeline_mode = #tpu.pipeline_mode<synchronous>, transform_indices = @transform_4, window_bounds = array<i64: 1, 128>}, {pipeline_mode = #tpu.pipeline_mode<synchronous>, transform_indices = @transform_5, window_bounds = array<i64: 128, 128>}, {pipeline_mode = #tpu.pipeline_mode<synchronous>, transform_indices = @transform_6, window_bounds = array<i64: 1, 128>}, {pipeline_mode = #tpu.pipeline_mode<synchronous>, transform_indices = @transform_7, window_bounds = array<i64: 128, 128>}, {pipeline_mode = #tpu.pipeline_mode<synchronous>, transform_indices = @transform_8, window_bounds = array<i64: 1, 128>}, {pipeline_mode = #tpu.pipeline_mode<synchronous>, transform_indices = @transform_9, window_bounds = array<i64: 128, 128>}, {pipeline_mode = #tpu.pipeline_mode<synchronous>, transform_indices = @transform_10, window_bounds = array<i64: 1, 128>}, {pipeline_mode = #tpu.pipeline_mode<synchronous>, transform_indices = @transform_11, window_bounds = array<i64: 1, 128>}, {pipeline_mode = #tpu.pipeline_mode<synchronous>, transform_indices = @transform_12, window_bounds = array<i64: 1, 1>}, {transform_indices = @transform_13, window_bounds = array<i64: 32, 128>}]} {
    %c0 = arith.constant 0 : index
    %c0_0 = arith.constant 0 : index
    %0 = vector.load %arg1[%c0, %c0_0] : memref<32x128xbf16, #tpu.memory_space<vmem>>, vector<32x128xbf16>
    %c0_1 = arith.constant 0 : index
    %c0_2 = arith.constant 0 : index
    %1 = vector.load %arg2[%c0_1, %c0_2] : memref<128x128xbf16, #tpu.memory_space<vmem>>, vector<128x128xbf16>
    %cst = arith.constant dense<0.000000e+00> : vector<32x128xf32>
    %2 = tpu.matmul %0, %1, %cst {dimension_numbers = #tpu.dot_dimension_numbers<[1], [0], [0], [1], [0, 0, 1, 1], [], []>} : vector<32x128xbf16>, vector<128x128xbf16>, vector<32x128xf32> -> vector<32x128xf32>
    %c0_3 = arith.constant 0 : index
    %c0_4 = arith.constant 0 : index
    %3 = vector.load %arg3[%c0_3, %c0_4] : memref<1x128xf32, #tpu.memory_space<vmem>>, vector<1x128xf32>
    %4 = vector.broadcast %3 : vector<1x128xf32> to vector<32x128xf32>
    %5 = arith.addf %2, %4 : vector<32x128xf32>
    %6 = arith.truncf %5 : vector<32x128xf32> to vector<32x128xbf16>
    %c0_5 = arith.constant 0 : index
    %c0_6 = arith.constant 0 : index
    %7 = vector.load %arg4[%c0_5, %c0_6] : memref<128x128xbf16, #tpu.memory_space<vmem>>, vector<128x128xbf16>
    %cst_7 = arith.constant dense<0.000000e+00> : vector<32x128xf32>
    %8 = tpu.matmul %6, %7, %cst_7 {dimension_numbers = #tpu.dot_dimension_numbers<[1], [0], [0], [1], [0, 0, 1, 1], [], []>} : vector<32x128xbf16>, vector<128x128xbf16>, vector<32x128xf32> -> vector<32x128xf32>
    %c0_8 = arith.constant 0 : index
    %c0_9 = arith.constant 0 : index
    %9 = vector.load %arg5[%c0_8, %c0_9] : memref<1x128xf32, #tpu.memory_space<vmem>>, vector<1x128xf32>
    %10 = vector.broadcast %9 : vector<1x128xf32> to vector<32x128xf32>
    %11 = arith.addf %8, %10 : vector<32x128xf32>
    %cst_10 = arith.constant 0.000000e+00 : f32
    %12 = vector.broadcast %cst_10 : f32 to vector<32x128xf32>
    %13 = arith.maximumf %11, %12 : vector<32x128xf32>
    %14 = arith.addf %5, %13 : vector<32x128xf32>
    %15 = arith.truncf %14 : vector<32x128xf32> to vector<32x128xbf16>
    %c0_11 = arith.constant 0 : index
    %c0_12 = arith.constant 0 : index
    %16 = vector.load %arg6[%c0_11, %c0_12] : memref<128x128xbf16, #tpu.memory_space<vmem>>, vector<128x128xbf16>
    %cst_13 = arith.constant dense<0.000000e+00> : vector<32x128xf32>
    %17 = tpu.matmul %15, %16, %cst_13 {dimension_numbers = #tpu.dot_dimension_numbers<[1], [0], [0], [1], [0, 0, 1, 1], [], []>} : vector<32x128xbf16>, vector<128x128xbf16>, vector<32x128xf32> -> vector<32x128xf32>
    %c0_14 = arith.constant 0 : index
    %c0_15 = arith.constant 0 : index
    %18 = vector.load %arg7[%c0_14, %c0_15] : memref<1x128xf32, #tpu.memory_space<vmem>>, vector<1x128xf32>
    %19 = vector.broadcast %18 : vector<1x128xf32> to vector<32x128xf32>
    %20 = arith.addf %17, %19 : vector<32x128xf32>
    %cst_16 = arith.constant 0.000000e+00 : f32
    %21 = vector.broadcast %cst_16 : f32 to vector<32x128xf32>
    %22 = arith.maximumf %20, %21 : vector<32x128xf32>
    %23 = arith.addf %14, %22 : vector<32x128xf32>
    %24 = arith.truncf %23 : vector<32x128xf32> to vector<32x128xbf16>
    %c0_17 = arith.constant 0 : index
    %c0_18 = arith.constant 0 : index
    %25 = vector.load %arg8[%c0_17, %c0_18] : memref<128x128xbf16, #tpu.memory_space<vmem>>, vector<128x128xbf16>
    %cst_19 = arith.constant dense<0.000000e+00> : vector<32x128xf32>
    %26 = tpu.matmul %24, %25, %cst_19 {dimension_numbers = #tpu.dot_dimension_numbers<[1], [0], [0], [1], [0, 0, 1, 1], [], []>} : vector<32x128xbf16>, vector<128x128xbf16>, vector<32x128xf32> -> vector<32x128xf32>
    %c0_20 = arith.constant 0 : index
    %c0_21 = arith.constant 0 : index
    %27 = vector.load %arg9[%c0_20, %c0_21] : memref<1x128xf32, #tpu.memory_space<vmem>>, vector<1x128xf32>
    %28 = vector.broadcast %27 : vector<1x128xf32> to vector<32x128xf32>
    %29 = arith.addf %26, %28 : vector<32x128xf32>
    %cst_22 = arith.constant 0.000000e+00 : f32
    %30 = vector.broadcast %cst_22 : f32 to vector<32x128xf32>
    %31 = arith.maximumf %29, %30 : vector<32x128xf32>
    %32 = arith.addf %23, %31 : vector<32x128xf32>
    %33 = arith.truncf %32 : vector<32x128xf32> to vector<32x128xbf16>
    %c0_23 = arith.constant 0 : index
    %c0_24 = arith.constant 0 : index
    %34 = vector.load %arg10[%c0_23, %c0_24] : memref<128x128xbf16, #tpu.memory_space<vmem>>, vector<128x128xbf16>
    %cst_25 = arith.constant dense<0.000000e+00> : vector<32x128xf32>
    %35 = tpu.matmul %33, %34, %cst_25 {dimension_numbers = #tpu.dot_dimension_numbers<[1], [0], [0], [1], [0, 0, 1, 1], [], []>} : vector<32x128xbf16>, vector<128x128xbf16>, vector<32x128xf32> -> vector<32x128xf32>
    %c0_26 = arith.constant 0 : index
    %c0_27 = arith.constant 0 : index
    %36 = vector.load %arg11[%c0_26, %c0_27] : memref<1x128xf32, #tpu.memory_space<vmem>>, vector<1x128xf32>
    %37 = vector.broadcast %36 : vector<1x128xf32> to vector<32x128xf32>
    %38 = arith.addf %35, %37 : vector<32x128xf32>
    %cst_28 = arith.constant 0.000000e+00 : f32
    %39 = vector.broadcast %cst_28 : f32 to vector<32x128xf32>
    %40 = arith.maximumf %38, %39 : vector<32x128xf32>
    %c0_29 = arith.constant 0 : index
    %c0_30 = arith.constant 0 : index
    %41 = vector.load %arg12[%c0_29, %c0_30] : memref<1x128xf32, #tpu.memory_space<vmem>>, vector<1x128xf32>
    %42 = vector.broadcast %41 : vector<1x128xf32> to vector<32x128xf32>
    %43 = arith.mulf %40, %42 : vector<32x128xf32>
    %cst_31 = arith.constant dense<0.000000e+00> : vector<32xf32>
    %44 = vector.multi_reduction <add>, %43, %cst_31 [1] : vector<32x128xf32> to vector<32xf32>
    %45 = vector.shape_cast %44 : vector<32xf32> to vector<32x1xf32>
    %c0_32 = arith.constant 0 : index
    %c0_33 = arith.constant 0 : index
    %46 = vector.load %arg13[%c0_32, %c0_33] : memref<1x1xf32, #tpu.memory_space<vmem>>, vector<1x1xf32>
    %47 = vector.broadcast %46 : vector<1x1xf32> to vector<32x1xf32>
    %48 = arith.addf %45, %47 : vector<32x1xf32>
    %49 = tpu.iota {dimensions = array<i32: 1>} : vector<1x128xi32>
    %c64_i32 = arith.constant 64 : i32
    %50 = vector.broadcast %c64_i32 : i32 to vector<1x128xi32>
    %51 = arith.cmpi sge, %49, %50 : vector<1x128xi32>
    %52 = arith.extui %51 : vector<1x128xi1> to vector<1x128xi32>
    %53 = arith.sitofp %52 : vector<1x128xi32> to vector<1x128xf32>
    %54 = vector.broadcast %48 : vector<32x1xf32> to vector<32x128xf32>
    %55 = vector.broadcast %53 : vector<1x128xf32> to vector<32x128xf32>
    %56 = arith.mulf %54, %55 : vector<32x128xf32>
    %57 = arith.addf %40, %56 : vector<32x128xf32>
    %c0_34 = arith.constant 0 : index
    %c0_35 = arith.constant 0 : index
    %58 = vector.load %arg14[%c0_34, %c0_35] : memref<32x128xf32, #tpu.memory_space<vmem>>, vector<32x128xf32>
    tpu.vector_store %arg14[%c0_34, %c0_35], %57 {strides = array<i32>} : memref<32x128xf32, #tpu.memory_space<vmem>>, vector<32x128xf32>,
    return
  }
  func.func @transform_0(%arg0: i32) -> (i32, i32) {
    %c0_i32 = arith.constant 0 : i32
    %c0_i32_0 = arith.constant 0 : i32
    return %arg0, %c0_i32 : i32, i32
  }
  func.func @transform_1(%arg0: i32) -> (i32, i32) {
    %c0_i32 = arith.constant 0 : i32
    %c0_i32_0 = arith.constant 0 : i32
    %c0_i32_1 = arith.constant 0 : i32
    return %c0_i32, %c0_i32_0 : i32, i32
  }
  func.func @transform_2(%arg0: i32) -> (i32, i32) {
    %c0_i32 = arith.constant 0 : i32
    %c0_i32_0 = arith.constant 0 : i32
    %c0_i32_1 = arith.constant 0 : i32
    return %c0_i32, %c0_i32_0 : i32, i32
  }
  func.func @transform_3(%arg0: i32) -> (i32, i32) {
    %c0_i32 = arith.constant 0 : i32
    %c0_i32_0 = arith.constant 0 : i32
    %c0_i32_1 = arith.constant 0 : i32
    return %c0_i32, %c0_i32_0 : i32, i32
  }
  func.func @transform_4(%arg0: i32) -> (i32, i32) {
    %c0_i32 = arith.constant 0 : i32
    %c0_i32_0 = arith.constant 0 : i32
    %c0_i32_1 = arith.constant 0 : i32
    return %c0_i32, %c0_i32_0 : i32, i32
  }
  func.func @transform_5(%arg0: i32) -> (i32, i32) {
    %c0_i32 = arith.constant 0 : i32
    %c0_i32_0 = arith.constant 0 : i32
    %c0_i32_1 = arith.constant 0 : i32
    return %c0_i32, %c0_i32_0 : i32, i32
  }
  func.func @transform_6(%arg0: i32) -> (i32, i32) {
    %c0_i32 = arith.constant 0 : i32
    %c0_i32_0 = arith.constant 0 : i32
    %c0_i32_1 = arith.constant 0 : i32
    return %c0_i32, %c0_i32_0 : i32, i32
  }
  func.func @transform_7(%arg0: i32) -> (i32, i32) {
    %c0_i32 = arith.constant 0 : i32
    %c0_i32_0 = arith.constant 0 : i32
    %c0_i32_1 = arith.constant 0 : i32
    return %c0_i32, %c0_i32_0 : i32, i32
  }
  func.func @transform_8(%arg0: i32) -> (i32, i32) {
    %c0_i32 = arith.constant 0 : i32
    %c0_i32_0 = arith.constant 0 : i32
    %c0_i32_1 = arith.constant 0 : i32
    return %c0_i32, %c0_i32_0 : i32, i32
  }
  func.func @transform_9(%arg0: i32) -> (i32, i32) {
    %c0_i32 = arith.constant 0 : i32
    %c0_i32_0 = arith.constant 0 : i32
    %c0_i32_1 = arith.constant 0 : i32
    return %c0_i32, %c0_i32_0 : i32, i32
  }
  func.func @transform_10(%arg0: i32) -> (i32, i32) {
    %c0_i32 = arith.constant 0 : i32
    %c0_i32_0 = arith.constant 0 : i32
    %c0_i32_1 = arith.constant 0 : i32
    return %c0_i32, %c0_i32_0 : i32, i32
  }
  func.func @transform_11(%arg0: i32) -> (i32, i32) {
    %c0_i32 = arith.constant 0 : i32
    %c0_i32_0 = arith.constant 0 : i32
    %c0_i32_1 = arith.constant 0 : i32
    return %c0_i32, %c0_i32_0 : i32, i32
  }
  func.func @transform_12(%arg0: i32) -> (i32, i32) {
    %c0_i32 = arith.constant 0 : i32
    %c0_i32_0 = arith.constant 0 : i32
    %c0_i32_1 = arith.constant 0 : i32
    return %c0_i32, %c0_i32_0 : i32, i32
  }
  func.func @transform_13(%arg0: i32) -> (i32, i32) {
    %c0_i32 = arith.constant 0 : i32
    %c0_i32_0 = arith.constant 0 : i32
    return %arg0, %c0_i32 : i32, i32
  }
}

</mosaic_0001>

<bundles_post_ra>
// kernel: stid_forward.1
= control target key start
LH: loop header
LB: loop body
LE: loop exit
PB: predicated region body
PF: predicated region fallthrough
CT: control target
= control target key end

     0   :  { %s1247_s1 = inlined_call_operand.vmem [shape: bf16[128,128], index: 1, kind: input, shape index: {}]   ;;  %s1248_s0 = inlined_call_operand.vmem [shape: bf16[32,128], index: 0, kind: input, shape index: {}]   ;;  %s1249_s3 = inlined_call_operand.vmem [shape: bf16[128,128], index: 3, kind: input, shape index: {}]   ;;  %s1250_s5 = inlined_call_operand.vmem [shape: bf16[128,128], index: 5, kind: input, shape index: {}]   ;;  %s1251_s2 = inlined_call_operand.vmem [shape: f32[1,128], index: 2, kind: input, shape index: {}]   ;;  %s1252_s7 = inlined_call_operand.vmem [shape: bf16[128,128], index: 7, kind: input, shape index: {}]   ;;  %s1253_s4 = inlined_call_operand.vmem [shape: f32[1,128], index: 4, kind: input, shape index: {}]   ;;  %s1254_s9 = inlined_call_operand.vmem [shape: bf16[128,128], index: 9, kind: input, shape index: {}]   ;;  %s1255_s6 = inlined_call_operand.vmem [shape: f32[1,128], index: 6, kind: input, shape index: {}]   ;;  %s1256_s8 = inlined_call_operand.vmem [shape: f32[1,128], index: 8, kind: input, shape index: {}]   ;;  %s1257_s12 = inlined_call_operand.<no memory space> [shape: f32[1,1], index: 12, kind: input, shape index: {}]   ;;  %s1258_s10 = inlined_call_operand.vmem [shape: f32[1,128], index: 10, kind: input, shape index: {}]   ;;  %s1259_s11 = inlined_call_operand.vmem [shape: f32[1,128], index: 11, kind: input, shape index: {}]   ;;  %s1260_s13 = inlined_call_operand.vmem [shape: f32[32,128], index: 13, kind: output, shape index: {}]  }
   0x1   :  { %v974_v0 = vld [vmem:[%s1247_s1] sm:$0xff]   ;;  %v975_v1 = vld [vmem:[%s1247_s1 + $0x8] sm:$0xff]   ;;  %v976_v2 = vld [vmem:[%s1247_s1 + $0x10] sm:$0xff]  }
   0x2   :  { %870 = vmatprep.subr.bf16.mxu0 %v974_v0  ;;  %v977_v3 = vld [vmem:[%s1247_s1 + $0x18] sm:$0xff]   ;;  %v982_v4 = vld [vmem:[%s1248_s0] sm:$0xff]   ;;  %v985_v6 = vld [vmem:[%s1249_s3 + $0x8] sm:$0xff]  }
   0x3   :  { %871 = vmatpush3.bf16.msra.mxu0 %v974_v0  ;;  %886 = vmatprep.mubr.bf16.mxu0 %v982_v4  ;;  %v984_v5 = vld [vmem:[%s1249_s3] sm:$0xff]   ;;  %v986_v8 = vld [vmem:[%s1249_s3 + $0x10] sm:$0xff]   ;;  %v979_v9 = vld [vmem:[%s1247_s1 + $0x28] sm:$0xff]  }
   0x4   :  { %872 = vmatprep.subr.bf16.mxu0 %v975_v1  ;;  %v978_v7 = vld [vmem:[%s1247_s1 + $0x20] sm:$0xff]   ;;  %890 = vmatprep.subr.bf16.mxu1 %v984_v5  ;;  %v987_v10 = vld [vmem:[%s1249_s3 + $0x18] sm:$0xff]   ;;  %v980_v11 = vld [vmem:[%s1247_s1 + $0x30] sm:$0xff]  }
   0x5   :  { %891 = vmatpush3.bf16.msra.mxu1 %v984_v5  ;;  %v988_v12 = vld [vmem:[%s1249_s3 + $0x20] sm:$0xff]   ;;  %v981_v13 = vld [vmem:[%s1247_s1 + $0x38] sm:$0xff]   ;;  %v989_v14 = vld [vmem:[%s1249_s3 + $0x28] sm:$0xff]  }
   0x6   :  { %892 = vmatprep.subr.bf16.mxu1 %v985_v6  ;;  %v983_v15 = vld [vmem:[%s1248_s0 + $0x8] sm:$0xff]   ;;  %v990_v16 = vld [vmem:[%s1249_s3 + $0x30] sm:$0xff]   ;;  %v991_v17 = vld [vmem:[%s1249_s3 + $0x38] sm:$0xff]  }
   0x7   :  { %873 = vmatpush3.bf16.msra.mxu0 %v975_v1  ;;  %v992_v18 = vld [vmem:[%s1250_s5] sm:$0xff]   ;;  %v993_v19 = vld [vmem:[%s1250_s5 + $0x8] sm:$0xff]   ;;  %v994_v20 = vld [vmem:[%s1250_s5 + $0x10] sm:$0xff]  }
   0x8   :  { %874 = vmatprep.subr.bf16.mxu0 %v976_v2  ;;  %v995_v21 = vld [vmem:[%s1250_s5 + $0x18] sm:$0xff]   ;;  %v996_v22 = vld [vmem:[%s1250_s5 + $0x20] sm:$0xff]   ;;  %v997_v34 = vld [vmem:[%s1250_s5 + $0x28] sm:$0xff]  }
   0x9   :  { %893 = vmatpush3.bf16.msra.mxu1 %v985_v6  ;;  %v770_v24 = vld [vmem:[%s1251_s2] ss:$0 sm:$0xff]  ;;  %v998_v35 = vld [vmem:[%s1250_s5 + $0x30] sm:$0xff]   ;;  %v999_v36 = vld [vmem:[%s1250_s5 + $0x38] sm:$0xff]  }
   0xa   :  { %894 = vmatprep.subr.bf16.mxu1 %v986_v8  ;;  %v1000_v37 = vld [vmem:[%s1252_s7] sm:$0xff]   ;;  %v1001_v38 = vld [vmem:[%s1252_s7 + $0x8] sm:$0xff]   ;;  %v1002_v39 = vld [vmem:[%s1252_s7 + $0x10] sm:$0xff]  }
   0xb   :  { %875 = vmatpush3.bf16.msra.mxu0 %v976_v2  ;;  %v1003_v40 = vld [vmem:[%s1252_s7 + $0x18] sm:$0xff]   ;;  %v1004_v41 = vld [vmem:[%s1252_s7 + $0x20] sm:$0xff]   ;;  %v1005_v61 = vld [vmem:[%s1252_s7 + $0x28] sm:$0xff]  }
   0xc   :  { %876 = vmatprep.subr.bf16.mxu0 %v977_v3  ;;  %v781_v42 = vld [vmem:[%s1253_s4] ss:$0 sm:$0xff]  ;;  %v1006_v62 = vld [vmem:[%s1252_s7 + $0x30] sm:$0xff]   ;;  %v1007_v63 = vld [vmem:[%s1252_s7 + $0x38] sm:$0xff]  }
   0xd   :  { %895 = vmatpush3.bf16.msra.mxu1 %v986_v8  ;;  %v1008_v0 = vld [vmem:[%s1254_s9] sm:$0xff]   ;;  %v1009_v1 = vld [vmem:[%s1254_s9 + $0x8] sm:$0xff]   ;;  %v1010_v2 = vld [vmem:[%s1254_s9 + $0x10] sm:$0xff]  }
   0xe   :  { %896 = vmatprep.subr.bf16.mxu1 %v987_v10  ;;  %v1012_v4 = vld [vmem:[%s1254_s9 + $0x20] sm:$0xff]  }
   0xf   :  { %877 = vmatpush3.bf16.msra.mxu0 %v977_v3  ;;  %v1011_v3 = vld [vmem:[%s1254_s9 + $0x18] sm:$0xff]   ;;  %v790_v5 = vld [vmem:[%s1255_s6] ss:$0 sm:$0xff] }
  0x10   :  { %878 = vmatprep.subr.bf16.mxu0 %v978_v7 }
  0x11   :  { %897 = vmatpush3.bf16.msra.mxu1 %v987_v10 }
  0x12   :  { %898 = vmatprep.subr.bf16.mxu1 %v988_v12 }
  0x13   :  { %879 = vmatpush3.bf16.msra.mxu0 %v978_v7 }
  0x14   :  { %880 = vmatprep.subr.bf16.mxu0 %v979_v9 }
  0x15   :  { %899 = vmatpush3.bf16.msra.mxu1 %v988_v12 }
  0x16   :  { %900 = vmatprep.subr.bf16.mxu1 %v989_v14 }
  0x17   :  { %881 = vmatpush3.bf16.msra.mxu0 %v979_v9 }
  0x18   :  { %882 = vmatprep.subr.bf16.mxu0 %v980_v11 }
  0x19   :  { %901 = vmatpush3.bf16.msra.mxu1 %v989_v14 }
  0x1a   :  { %902 = vmatprep.subr.bf16.mxu1 %v990_v16 }
  0x1b   :  { %883 = vmatpush3.bf16.msra.mxu0 %v980_v11 }
  0x1c   :  { %884 = vmatprep.subr.bf16.mxu0 %v981_v13 }
  0x1d   :  { %903 = vmatpush3.bf16.msra.mxu1 %v990_v16 }
  0x1e   :  { %904 = vmatprep.subr.bf16.mxu1 %v991_v17 }
  0x1f   :  { %885 = vmatpush3.bf16.msra.mxu0 %v981_v13 }
  0x20   :  { %910 = vmatprep.subr.bf16.mxu0 %v992_v18 }
  0x21   :  { %905 = vmatpush3.bf16.msra.mxu1 %v991_v17 }
  0x22   :  { %887 = vmatmul.mubr.bf16.vlgmr.msra.gmra.mrb[0].mxu0 %v983_v15  ;;  %930 = vmatprep.subr.bf16.mxu1 %v1000_v37 }
  0x23   :  { %911 = vmatpush3.bf16.msra.mxu0 %v992_v18 }
  0x24   :  { %912 = vmatprep.subr.bf16.mxu0 %v993_v19 }
  0x27   :  { %913 = vmatpush3.bf16.msra.mxu0 %v993_v19 }
  0x28   :  { %914 = vmatprep.subr.bf16.mxu0 %v994_v20 }
  0x2b   :  { %915 = vmatpush3.bf16.msra.mxu0 %v994_v20 }
  0x2c   :  { %916 = vmatprep.subr.bf16.mxu0 %v995_v21 }
  0x2f   :  { %917 = vmatpush3.bf16.msra.mxu0 %v995_v21 }
  0x30   :  { %918 = vmatprep.subr.bf16.mxu0 %v996_v22 }
  0x33   :  { %919 = vmatpush3.bf16.msra.mxu0 %v996_v22 }
  0x34   :  { %920 = vmatprep.subr.bf16.mxu0 %v997_v34 }
  0x37   :  { %921 = vmatpush3.bf16.msra.mxu0 %v997_v34 }
  0x38   :  { %922 = vmatprep.subr.bf16.mxu0 %v998_v35 }
  0x3b   :  { %923 = vmatpush3.bf16.msra.mxu0 %v998_v35 }
  0x3c   :  { %924 = vmatprep.subr.bf16.mxu0 %v999_v36 }
  0x3f   :  { %925 = vmatpush3.bf16.msra.mxu0 %v999_v36 }
  0x40   :  { %950 = vmatprep.subr.bf16.mxu0 %v1008_v0 }
  0xf5   :  { %v888_v23 = vpop.f32.mrb[0].mxu0 }
  0xf6   :  { %v168_v25 = vpop.f32.mrb[1].mxu0  ;;  %v177_v31 = vadd.f32 %v888_v23, %v770_v24 }
  0xf7   :  { %v889_v26 = vpop.f32.mrb[2].mxu0  ;;  %v169_v29 = vadd.f32 %v770_v24, %v168_v25  ;;  %v1014_v25 = vld [vmem:[%s1254_s9 + $0x30] sm:$0xff]  }
  0xf8   :  { %v180_v27 = vadd.f32 %v889_v26, %v770_v24  ;;  %v171_v28 = vpop.f32.mrb[3].mxu0  ;;  %v1015_v26 = vld [vmem:[%s1254_s9 + $0x38] sm:$0xff]  }
  0xf9   :  { %v172_v30 = vadd.f32 %v770_v24, %v171_v28  ;;  %v1013_v24 = vld [vmem:[%s1254_s9 + $0x28] sm:$0xff]  }
  0xfa   :  { %v184_v33 = vpack.c.bf16 %v180_v27, %v177_v31 }
  0xfb   :  { %v183_v32 = vpack.c.bf16 %v172_v30, %v169_v29 }
  0xfd   :  { %906 = vmatprep.mubr.bf16.mxu1 %v183_v32 }
  0xfe   :  { %907 = vmatmul.mubr.bf16.vlgmr.msra.gmra.mrb[0].mxu1 %v184_v33 }
  0xff   :  { %931 = vmatpush3.bf16.msra.mxu1 %v1000_v37 }
 0x100   :  { %932 = vmatprep.subr.bf16.mxu1 %v1001_v38 }
 0x103   :  { %933 = vmatpush3.bf16.msra.mxu1 %v1001_v38 }
 0x104   :  { %934 = vmatprep.subr.bf16.mxu1 %v1002_v39 }
 0x107   :  { %935 = vmatpush3.bf16.msra.mxu1 %v1002_v39 }
 0x108   :  { %936 = vmatprep.subr.bf16.mxu1 %v1003_v40 }
 0x10b   :  { %937 = vmatpush3.bf16.msra.mxu1 %v1003_v40 }
 0x10c   :  { %938 = vmatprep.subr.bf16.mxu1 %v1004_v41 }
 0x10f   :  { %939 = vmatpush3.bf16.msra.mxu1 %v1004_v41 }
 0x110   :  { %940 = vmatprep.subr.bf16.mxu1 %v1005_v61 }
 0x113   :  { %941 = vmatpush3.bf16.msra.mxu1 %v1005_v61 }
 0x114   :  { %942 = vmatprep.subr.bf16.mxu1 %v1006_v62 }
 0x117   :  { %943 = vmatpush3.bf16.msra.mxu1 %v1006_v62 }
 0x118   :  { %944 = vmatprep.subr.bf16.mxu1 %v1007_v63 }
 0x11b   :  { %945 = vmatpush3.bf16.msra.mxu1 %v1007_v63 }
 0x1d1   :  { %v908_v43 = vpop.f32.mrb[0].mxu1 }
 0x1d2   :  { %v299_v44 = vadd.f32 %v908_v43, %v781_v42  ;;  %v290_v45 = vpop.f32.mrb[1].mxu1 }
 0x1d3   :  { %v291_v46 = vadd.f32 %v781_v42, %v290_v45  ;;  %v909_v47 = vpop.f32.mrb[2].mxu1 }
 0x1d4   :  { %v302_v48 = vadd.f32 %v909_v47, %v781_v42  ;;  %v293_v49 = vpop.f32.mrb[3].mxu1  ;;  %v307_v52 = vmax.f32 %v299_v44, 0.0  ;;  %v808_v47 = vld [vmem:[%s1258_s10] ss:$0 sm:$0xff] }
 0x1d5   :  { %v305_v50 = vmax.f32 %v291_v46, 0.0  ;;  %v294_v51 = vadd.f32 %v781_v42, %v293_v49  ;;  %v18_v46 = vstv %s1257_s12 }
 0x1d6   :  { %v308_v53 = vmax.f32 %v302_v48, 0.0  ;;  %v311_v58 = vadd.f32 %v307_v52, %v177_v31  ;;  %19 = vst [vmem:[#allocation2] sm:$0x1] %v18_v46 }
 0x1d7   :  { %v306_v54 = vmax.f32 %v294_v51, 0.0  ;;  %v309_v56 = vadd.f32 %v305_v50, %v169_v29 }
 0x1d8   :  { %v312_v55 = vadd.f32 %v308_v53, %v180_v27  ;;  %v799_v27 = vld [vmem:[%s1256_s8] ss:$0 sm:$0xff] }
 0x1d9   :  { %v310_v57 = vadd.f32 %v306_v54, %v172_v30  ;;  %v817_v53 = vld [vmem:[%s1259_s11] ss:$0 sm:$0xff] }
 0x1da   :  { %v314_v60 = vpack.c.bf16 %v312_v55, %v311_v58 }
 0x1db   :  { %v313_v59 = vpack.c.bf16 %v310_v57, %v309_v56 }
 0x1dd   :  { %926 = vmatprep.mubr.bf16.mxu0 %v313_v59 }
 0x1de   :  { %927 = vmatmul.mubr.bf16.vlgmr.msra.gmra.mrb[4].mxu0 %v314_v60 }
 0x1df   :  { %951 = vmatpush3.bf16.msra.mxu0 %v1008_v0 }
 0x1e0   :  { %952 = vmatprep.subr.bf16.mxu0 %v1009_v1 }
 0x1e3   :  { %953 = vmatpush3.bf16.msra.mxu0 %v1009_v1  ;;  %v1016_v1 = vmov 0  }
 0x1e4   :  { %954 = vmatprep.subr.bf16.mxu0 %v1010_v2  ;;  %973 = vset.pattern.permute.xlu1 %v1016_v1 }
 0x1e5   :  { %972 = vset.pattern.permute.xlu0 %v1016_v1 }
 0x1e7   :  { %955 = vmatpush3.bf16.msra.mxu0 %v1010_v2  ;;  %v818_v2 = vld [vmem:[#allocation2] ss:$0 sm:$0xff] }
 0x1e8   :  { %956 = vmatprep.subr.bf16.mxu0 %v1011_v3 }
 0x1eb   :  { %957 = vmatpush3.bf16.msra.mxu0 %v1011_v3 }
 0x1ec   :  { %958 = vmatprep.subr.bf16.mxu0 %v1012_v4 }
 0x1ef   :  { %959 = vmatpush3.bf16.msra.mxu0 %v1012_v4 }
 0x1f0   :  { %960 = vmatprep.subr.bf16.mxu0 %v1013_v24 }
 0x1f3   :  { %961 = vmatpush3.bf16.msra.mxu0 %v1013_v24 }
 0x1f4   :  { %962 = vmatprep.subr.bf16.mxu0 %v1014_v25 }
 0x1f7   :  { %963 = vmatpush3.bf16.msra.mxu0 %v1014_v25 }
 0x1f8   :  { %964 = vmatprep.subr.bf16.mxu0 %v1015_v26 }
 0x1fb   :  { %965 = vmatpush3.bf16.msra.mxu0 %v1015_v26 }
 0x2b1   :  { %v928_v6 = vpop.f32.mrb[4].mxu0 }
 0x2b2   :  { %v429_v7 = vadd.f32 %v928_v6, %v790_v5  ;;  %v420_v8 = vpop.f32.mrb[5].mxu0 }
 0x2b3   :  { %v421_v9 = vadd.f32 %v790_v5, %v420_v8  ;;  %v929_v10 = vpop.f32.mrb[6].mxu0 }
 0x2b4   :  { %v432_v11 = vadd.f32 %v929_v10, %v790_v5  ;;  %v423_v12 = vpop.f32.mrb[7].mxu0  ;;  %v437_v15 = vmax.f32 %v429_v7, 0.0 }
 0x2b5   :  { %v435_v13 = vmax.f32 %v421_v9, 0.0  ;;  %v424_v14 = vadd.f32 %v790_v5, %v423_v12 }
 0x2b6   :  { %v438_v16 = vmax.f32 %v432_v11, 0.0  ;;  %v441_v21 = vadd.f32 %v437_v15, %v311_v58  ;;  %v729_v11 = vlaneseq }
 0x2b7   :  { %v436_v17 = vmax.f32 %v424_v14, 0.0  ;;  %v439_v19 = vadd.f32 %v435_v13, %v309_v56  ;;  %v1017_v13 = vmov 0.0  }
 0x2b8   :  { %v442_v18 = vadd.f32 %v438_v16, %v312_v55  ;;  %v730_v12 = vand.u32 127, %v729_v11 }
 0x2b9   :  { %v440_v20 = vadd.f32 %v436_v17, %v310_v57 }
 0x2ba   :  { %v444_v23 = vpack.c.bf16 %v442_v18, %v441_v21  ;;  %vm731_vm0 = vcmp.ge.s32.totalorder %v730_v12, 64 }
 0x2bb   :  { %v443_v22 = vpack.c.bf16 %v440_v20, %v439_v19  ;;  %v819_v14 = vsel %vm731_vm0, 1.0, %v1017_v13 }
 0x2bd   :  { %946 = vmatprep.mubr.bf16.mxu1 %v443_v22 }
 0x2be   :  { %947 = vmatmul.mubr.bf16.vlgmr.msra.gmra.mrb[4].mxu1 %v444_v23 }
 0x391   :  { %v948_v28 = vpop.f32.mrb[4].mxu1 }
 0x392   :  { %v559_v29 = vadd.f32 %v948_v28, %v799_v27  ;;  %v550_v30 = vpop.f32.mrb[5].mxu1 }
 0x393   :  { %v551_v31 = vadd.f32 %v799_v27, %v550_v30  ;;  %v949_v32 = vpop.f32.mrb[6].mxu1 }
 0x394   :  { %v567_v33 = vmax.f32 %v559_v29, 0.0  ;;  %v562_v34 = vadd.f32 %v949_v32, %v799_v27  ;;  %v553_v35 = vpop.f32.mrb[7].mxu1 }
 0x395   :  { %v565_v36 = vmax.f32 %v551_v31, 0.0  ;;  %v554_v37 = vadd.f32 %v799_v27, %v553_v35 }
 0x396   :  { %v568_v38 = vmax.f32 %v562_v34, 0.0  ;;  %v571_v40 = vadd.f32 %v567_v33, %v441_v21 }
 0x397   :  { %v566_v39 = vmax.f32 %v554_v37, 0.0  ;;  %v569_v42 = vadd.f32 %v565_v36, %v439_v19 }
 0x398   :  { %v572_v41 = vadd.f32 %v568_v38, %v442_v18 }
 0x399   :  { %v570_v43 = vadd.f32 %v566_v39, %v440_v20 }
 0x39a   :  { %v574_v44 = vpack.c.bf16 %v572_v41, %v571_v40 }
 0x39b   :  { %v573_v45 = vpack.c.bf16 %v570_v43, %v569_v42 }
 0x39d   :  { %966 = vmatprep.mubr.bf16.mxu0 %v573_v45 }
 0x39e   :  { %967 = vmatmul.mubr.bf16.vlgmr.msra.gmra.mrb[8].mxu0 %v574_v44 }
 0x471   :  { %v968_v48 = vpop.f32.mrb[8].mxu0 }
 0x472   :  { %v689_v49 = vadd.f32 %v968_v48, %v808_v47  ;;  %v680_v50 = vpop.f32.mrb[9].mxu0 }
 0x473   :  { %v681_v51 = vadd.f32 %v808_v47, %v680_v50  ;;  %v969_v52 = vpop.f32.mrb[10].mxu0 }
 0x474   :  { %v697_v54 = vmax.f32 %v689_v49, 0.0  ;;  %v692_v55 = vadd.f32 %v969_v52, %v808_v47  ;;  %v683_v56 = vpop.f32.mrb[11].mxu0 }
 0x475   :  { %v695_v57 = vmax.f32 %v681_v51, 0.0  ;;  %v684_v58 = vadd.f32 %v808_v47, %v683_v56 }
 0x476   :  { %v698_v59 = vmax.f32 %v692_v55, 0.0  ;;  %v708_v60 = vmul.f32 %v817_v53, %v697_v54 }
 0x477   :  { %v696_v61 = vmax.f32 %v684_v58, 0.0  ;;  %v706_v62 = vmul.f32 %v817_v53, %v695_v57 }
 0x478   :  { %714 = vadd.xlane.f32.xlu1 %v708_v60  ;;  %v709_v63 = vmul.f32 %v817_v53, %v698_v59 }
 0x479   :  { %710 = vadd.xlane.f32.xlu0 %v706_v62  ;;  %v707_v0 = vmul.f32 %v817_v53, %v696_v61 }
 0x47c   :  { %716 = vadd.xlane.f32.xlu1 %v709_v63 }
 0x47d   :  { %712 = vadd.xlane.f32.xlu0 %v707_v0 }
 0x505   :  { %v715_v3 = vpop.xlane.xlu1 %714 }
 0x506   :  { %v727_v4 = vadd.f32 %v818_v2, %v715_v3  ;;  %v711_v5 = vpop.xlane.xlu0 %710 }
 0x507   :  { %v725_v6 = vadd.f32 %v818_v2, %v711_v5 }
 0x508   :  { %746 = vperm.xlu1 %973, %v727_v4  }
 0x509   :  { %736 = vperm.xlu0 %972, %v725_v6   ;;  %v717_v9 = vpop.xlane.xlu1 %716 }
 0x50a   :  { %v713_v7 = vpop.xlane.xlu0 %712  ;;  %v728_v10 = vadd.f32 %v818_v2, %v717_v9 }
 0x50b   :  { %v726_v8 = vadd.f32 %v818_v2, %v713_v7 }
 0x50d   :  { %741 = vperm.xlu1 %973, %v726_v8  }
 0x511   :  { %751 = vperm.xlu1 %973, %v728_v10  }
 0x587   :  { %v747_v15 = vpop.permute.xlu1 %746 }
 0x588   :  { %v756_v16 = vmul.f32 %v819_v14, %v747_v15  ;;  %v737_v17 = vpop.permute.xlu0 %736 }
 0x589   :  { %v754_v18 = vmul.f32 %v819_v14, %v737_v17 }
 0x58a   :  { %v760_v19 = vadd.f32 %v756_v16, %v697_v54 }
 0x58b   :  { %v758_v20 = vadd.f32 %v754_v18, %v695_v57 }
 0x58c   :  { %764 = vst [vmem:[%s1260_s13 + $0x10] sm:$0xff] %v760_v19  ;;  %v742_v21 = vpop.permute.xlu1 %741 }
 0x58d   :  { %762 = vst [vmem:[%s1260_s13] sm:$0xff] %v758_v20  ;;  %v755_v22 = vmul.f32 %v819_v14, %v742_v21 }
 0x58f   :  { %v759_v23 = vadd.f32 %v755_v22, %v696_v61 }
 0x590   :  { %v752_v24 = vpop.permute.xlu1 %751 }
 0x591   :  { %763 = vst [vmem:[%s1260_s13 + $0x8] sm:$0xff] %v759_v23  ;;  %v757_v25 = vmul.f32 %v819_v14, %v752_v24 }
 0x593   :  { %v761_v26 = vadd.f32 %v757_v25, %v698_v59 }
 0x595   :  { %765 = vst [vmem:[%s1260_s13 + $0x18] sm:$0xff] %v761_v26 }

</bundles_post_ra>
